<compile_context>
chip_gen: v6e
topology: v6e:2x2x1
jax: 0.10.0
libtpu: 0.0.40
codegen_flags: <defaults>
</compile_context>

<pallas_src>
import functools

import jax
import jax.numpy as jnp
from jax import lax
from jax.experimental import pallas as pl
from jax.experimental.pallas import tpu as pltpu

_MIB = 1024 * 1024


# --------------------------------------------------------------------------- #
# Sizing helpers
# --------------------------------------------------------------------------- #
def _round_up(x, m):
    return ((x + m - 1) // m) * m


def _vmem_capacity_bytes():
    """Physical VMEM per core; falls back to the smallest generation (v7x)."""
    try:
        return int(pltpu.get_tpu_info().vmem_capacity_bytes)
    except Exception:
        return 64 * _MIB


def _budgets():
    """Returns (tile working-set budget, vmem_limit_bytes) for this chip."""
    cap = _vmem_capacity_bytes()
    tile_budget = max(8 * _MIB, min(cap // 4, 32 * _MIB))          # 16 MiB v7x, 32 MiB v5e/v6e
    vmem_limit = max(min(cap - 16 * _MIB, 2 * tile_budget), tile_budget)
    return tile_budget, vmem_limit


def _choose_row_tile(ncp, cap=256):
    """Multiple of 8 that divides ncp (ncp is already a multiple of 8)."""
    tr = min(ncp, cap)
    tr -= tr % 8
    while ncp % tr:
        tr -= 8
    return tr


def _choose_lane_tile(hw_pad, rows, n_buffers, budget_bytes, cap=4096, dtype_bytes=4):
    """Largest multiple-of-128 lane tile that divides hw_pad while keeping
    n_buffers (rows, tile) f32 buffers under the budget."""
    max_t = budget_bytes // (n_buffers * rows * dtype_bytes)
    max_t = max(128, (max_t // 128) * 128)
    t = min(hw_pad, max_t, cap)
    while hw_pad % t:
        t -= 128
    return t


# --------------------------------------------------------------------------- #
# Kernels
# --------------------------------------------------------------------------- #
def _fused_kernel(x_ref, w1_ref, w2_ref, out_ref, *, inv_hw, hw_valid, masked):
    """Single pass per sample: global max/avg pool + 1x1-conv MLP + sigmoid +
    residual scale while the (C, HWpad) slab is resident in VMEM."""
    x = x_ref[0]                                                      # (C, HWpad)
    if masked:
        col = lax.broadcasted_iota(jnp.int32, x.shape, 1)
        x_for_max = jnp.where(col < hw_valid, x, -jnp.inf)            # pad -> -inf for max
    else:
        x_for_max = x
    max_p = jnp.max(x_for_max, axis=-1, keepdims=True)                # (C, 1)
    avg_p = jnp.sum(x, axis=-1, keepdims=True) * inv_hw               # zero pad is sum-neutral
    pooled = jnp.concatenate([max_p, avg_p], axis=1)                  # (C, 2)
    # Tiny MLP, once per sample, hidden under the next sample's DMA.
    h = jnp.maximum(
        jnp.dot(w1_ref[...], pooled, preferred_element_type=jnp.float32), 0.0)
    logits2 = jnp.dot(w2_ref[...], h, preferred_element_type=jnp.float32)  # (C, 2)
    logits = logits2[:, 0:1] + logits2[:, 1:2]                        # (C, 1)
    scale = 1.0 / (1.0 + jnp.exp(-logits)) + 1.0                      # sigmoid + residual
    out_ref[0] = x * scale


def _pool_kernel(x_ref, maxl_ref, suml_ref, *, t_hw, hw_valid, masked):
    """Phase 1 (fallback): streaming lane-wide max/sum over HW tiles.
    Outputs are (TR, 128) lane-wide partials accumulated in the resident
    output block -- pure vld + VALU, no per-tile cross-lane reduce."""
    t = pl.program_id(1)

    @pl.when(t == 0)
    def _init():
        maxl_ref[...] = jnp.full_like(maxl_ref, -jnp.inf)
        suml_ref[...] = jnp.zeros_like(suml_ref)

    x = x_ref[...]                                                    # (TR, t_hw)
    m = maxl_ref[...]
    s = suml_ref[...]
    base = t * t_hw
    for g in range(t_hw // 128):                                      # static unroll, VALU fold
        chunk = x[:, g * 128:(g + 1) * 128]                           # aligned view, no relayout
        if masked:
            col = base + g * 128 + lax.broadcasted_iota(jnp.int32, chunk.shape, 1)
            m = jnp.maximum(m, jnp.where(col < hw_valid, chunk, -jnp.inf))
        else:
            m = jnp.maximum(m, chunk)
        s = s + chunk                                                 # zero pad is sum-neutral
    maxl_ref[...] = m
    suml_ref[...] = s


def _apply_kernel(scale_ref, x_ref, out_ref):
    """Phase 2 (fallback): out = x * (scale + 1), lane-dense tiles."""
    out_ref[...] = x_ref[...] * scale_ref[...]                        # (TR,t)* (TR,1) broadcast


# --------------------------------------------------------------------------- #
# Forward
# --------------------------------------------------------------------------- #
def canet_forward(x_nchw, w1, w2, *, force_two_phase=False):
    """CANet forward.

    x_nchw: (N, C, H, W) float32
    w1:     (hidden, C)  float32  -- Conv2d(C, hidden, 1).weight squeezed
    w2:     (C, hidden)  float32  -- Conv2d(hidden, C, 1).weight squeezed
    """
    N, C, H, W = x_nchw.shape
    HW = H * W
    hw_pad = _round_up(HW, 128)
    masked = hw_pad != HW
    inv_hw = 1.0 / HW

    tile_budget, vmem_limit = _budgets()

    def cparams(sem):
        return pltpu.CompilerParams(dimension_semantics=sem,
                                    vmem_limit_bytes=vmem_limit)

    # ---------------- Fused single-pass fast path ---------------- #
    c_sub = _round_up(C, 8)                 # sublane-padded rows in VMEM
    fused_slabs = 4 + (1 if masked else 0)  # 2x in, 2x out buffers (+ mask temp)
    fused_ws = fused_slabs * c_sub * hw_pad * 4

    if fused_ws <= tile_budget and not force_two_phase:
        x3 = x_nchw.reshape(N, C, HW)
        if masked:
            x3 = jnp.pad(x3, ((0, 0), (0, 0), (0, hw_pad - HW)))
        blk = pl.BlockSpec((1, C, hw_pad), lambda n: (n, 0, 0))
        wspec = pl.BlockSpec(memory_space=pltpu.MemorySpace.VMEM)
        out3 = pl.pallas_call(
            functools.partial(_fused_kernel, inv_hw=inv_hw, hw_valid=HW, masked=masked),
            out_shape=jax.ShapeDtypeStruct((N, C, hw_pad), jnp.float32),
            grid_spec=pltpu.PrefetchScalarGridSpec(
                num_scalar_prefetch=0,
                grid=(N,),
                in_specs=[blk, wspec, wspec],
                out_specs=blk,
            ),
            compiler_params=cparams(("parallel",)),
        )(x3, w1, w2)
        return out3[..., :HW].reshape(N, C, H, W)

    # ---------------- Two-phase streaming fallback ---------------- #
    NC = N * C
    ncp = _round_up(NC, 8)
    x2 = x_nchw.reshape(NC, HW)
    if masked or ncp != NC:
        x2 = jnp.pad(x2, ((0, ncp - NC), (0, hw_pad - HW)))

    tr = _choose_row_tile(ncp)

    # Phase 1: only the input is pipeline-buffered -> bigger tile than phase 2.
    t1 = _choose_lane_tile(hw_pad, tr, n_buffers=2, budget_bytes=tile_budget)
    maxl, suml = pl.pallas_call(
        functools.partial(_pool_kernel, t_hw=t1, hw_valid=HW, masked=masked),
        out_shape=(jax.ShapeDtypeStruct((ncp, 128), jnp.float32),
                   jax.ShapeDtypeStruct((ncp, 128), jnp.float32)),
        grid_spec=pltpu.PrefetchScalarGridSpec(
            num_scalar_prefetch=0,
            grid=(ncp // tr, hw_pad // t1),
            in_specs=[pl.BlockSpec((tr, t1), lambda r, t: (r, t))],
            out_specs=(pl.BlockSpec((tr, 128), lambda r, t: (r, 0)),
                       pl.BlockSpec((tr, 128), lambda r, t: (r, 0))),
        ),
        compiler_params=cparams(("parallel", "arbitrary")),
    )(x2)

    # Final 128->1 reduce + tiny MLP + sigmoid in plain JAX (O(N*C) work).
    max_p = jnp.max(maxl[:NC], axis=-1).reshape(N, C)
    avg_p = (jnp.sum(suml[:NC], axis=-1) * inv_hw).reshape(N, C)

    def mlp(p):
        return jnp.maximum(p @ w1.T, 0.0) @ w2.T

    scale = jax.nn.sigmoid(mlp(max_p) + mlp(avg_p)) + 1.0             # (N, C)
    scale_rows = scale.reshape(NC, 1)
    if ncp != NC:
        scale_rows = jnp.pad(scale_rows, ((0, ncp - NC), (0, 0)))

    # Phase 2: stream x and apply the per-row scale.
    # TODO(synk): pass input_output_aliases={1: 0} here when the caller donates x.
    t2 = _choose_lane_tile(hw_pad, tr, n_buffers=4, budget_bytes=tile_budget)
    out2 = pl.pallas_call(
        _apply_kernel,
        out_shape=jax.ShapeDtypeStruct((ncp, hw_pad), jnp.float32),
        grid_spec=pltpu.PrefetchScalarGridSpec(
            num_scalar_prefetch=0,
            grid=(ncp // tr, hw_pad // t2),
            in_specs=[pl.BlockSpec((tr, 1), lambda r, t: (r, 0)),
                      pl.BlockSpec((tr, t2), lambda r, t: (r, t))],
            out_specs=pl.BlockSpec((tr, t2), lambda r, t: (r, t)),
        ),
        compiler_params=cparams(("parallel", "parallel")),
    )(scale_rows, x2)

    return out2[:NC, :HW].reshape(N, C, H, W)


def canet_reference(x_nchw, w1, w2):
    """Pure-JAX reference mirroring the PyTorch forward."""
    max_p = jnp.max(x_nchw, axis=(2, 3))   # (N, C)
    avg_p = jnp.mean(x_nchw, axis=(2, 3))  # (N, C)

    def mlp(p):
        return jnp.maximum(p @ w1.T, 0.0) @ w2.T

    scale = jax.nn.sigmoid(mlp(max_p) + mlp(avg_p))      # (N, C)
    return scale[:, :, None, None] * x_nchw + x_nchw


# --------------------------------------------------------------------------- #
# Demo / self-check
# --------------------------------------------------------------------------- #
if __name__ == "__main__":
    fwd = jax.jit(canet_forward, static_argnames=("force_two_phase",))

    def check(x, w1, w2, **kw):
        out = fwd(x, w1, w2, **kw)
        jax.block_until_ready(out)
        ref = canet_reference(x, w1, w2)
        assert out.shape == x.shape
        assert jnp.allclose(out, ref, atol=1e-5, rtol=1e-5), "mismatch vs reference"

    key = jax.random.PRNGKey(0)
    kx, k1, k2, kx2, k3, k4 = jax.random.split(key, 6)

    # Primary demo shapes: N=2, C=4, H=W=16 (takes the fused single-pass path).
    N, C, H, W = 2, 4, 16, 16
    hidden = C // (C // 2)  # = 2
    x = jax.random.normal(kx, (N, C, H, W), dtype=jnp.float32)
    w1 = 0.1 * jax.random.normal(k1, (hidden, C), dtype=jnp.float32)
    w2 = 0.1 * jax.random.normal(k2, (C, hidden), dtype=jnp.float32)
    check(x, w1, w2)                           # fused path
    check(x, w1, w2, force_two_phase=True)     # streaming two-phase path

    # Non-128-divisible H*W with all-negative values exercises the pad masking
    # (padded zeros must not leak into the global max).
    N2, C2, H2, W2 = 2, 6, 9, 9
    hidden2 = C2 // (C2 // 2)  # = 2
    x2 = -jnp.abs(jax.random.normal(kx2, (N2, C2, H2, W2), dtype=jnp.float32)) - 0.5
    w1b = 0.1 * jax.random.normal(k3, (hidden2, C2), dtype=jnp.float32)
    w2b = 0.1 * jax.random.normal(k4, (C2, hidden2), dtype=jnp.float32)
    check(x2, w1b, w2b)                        # fused path + padding mask
    check(x2, w1b, w2b, force_two_phase=True)  # two-phase path + padding mask

    print("KERNEL_OK")
</pallas_src>

<mosaic_0001>
module attributes {stable_mosaic.version = 11 : i64} {
  func.func @_fused_kernel(%arg0: i32, %arg1: memref<1x4x256xf32, #tpu.memory_space<vmem>>, %arg2: memref<2x4xf32, #tpu.memory_space<vmem>>, %arg3: memref<4x2xf32, #tpu.memory_space<vmem>>, %arg4: memref<1x4x256xf32, #tpu.memory_space<vmem>>) attributes {dimension_semantics = [#tpu.dimension_semantics<parallel>], iteration_bounds = array<i64: 2>, scalar_prefetch = 0 : i64, scratch_operands = 0 : i64, tpu.core_type = #tpu.core_type<tc>, window_params = [{transform_indices = @transform_0, window_bounds = array<i64: 1, 4, 256>}, {pipeline_mode = #tpu.pipeline_mode<synchronous>, transform_indices = @transform_1, window_bounds = array<i64: 2, 4>}, {pipeline_mode = #tpu.pipeline_mode<synchronous>, transform_indices = @transform_2, window_bounds = array<i64: 4, 2>}, {transform_indices = @transform_3, window_bounds = array<i64: 1, 4, 256>}]} {
    %c0 = arith.constant 0 : index
    %c0_0 = arith.constant 0 : index
    %c0_1 = arith.constant 0 : index
    %0 = vector.load %arg1[%c0, %c0_0, %c0_1] : memref<1x4x256xf32, #tpu.memory_space<vmem>>, vector<1x4x256xf32>
    %1 = vector.shape_cast %0 : vector<1x4x256xf32> to vector<4x256xf32>
    %cst = arith.constant dense<0xFF800000> : vector<4xf32>
    %2 = vector.multi_reduction <maximumf>, %1, %cst [1] : vector<4x256xf32> to vector<4xf32>
    %3 = vector.shape_cast %2 : vector<4xf32> to vector<4x1xf32>
    %cst_2 = arith.constant dense<0.000000e+00> : vector<4xf32>
    %4 = vector.multi_reduction <add>, %1, %cst_2 [1] : vector<4x256xf32> to vector<4xf32>
    %5 = vector.shape_cast %4 : vector<4xf32> to vector<4x1xf32>
    %cst_3 = arith.constant 3.906250e-03 : f32
    %6 = vector.broadcast %cst_3 : f32 to vector<4x1xf32>
    %7 = arith.mulf %5, %6 : vector<4x1xf32>
    %8 = tpu.concatenate %3, %7 in 1 : vector<4x1xf32>, vector<4x1xf32> -> vector<4x2xf32>
    %c0_4 = arith.constant 0 : index
    %c0_5 = arith.constant 0 : index
    %9 = vector.load %arg2[%c0_4, %c0_5] : memref<2x4xf32, #tpu.memory_space<vmem>>, vector<2x4xf32>
    %cst_6 = arith.constant dense<0.000000e+00> : vector<2x2xf32>
    %10 = tpu.matmul %9, %8, %cst_6 {dimension_numbers = #tpu.dot_dimension_numbers<[1], [0], [0], [1], [0, 0, 1, 1], [], []>} : vector<2x4xf32>, vector<4x2xf32>, vector<2x2xf32> -> vector<2x2xf32>
    %cst_7 = arith.constant 0.000000e+00 : f32
    %11 = vector.broadcast %cst_7 : f32 to vector<2x2xf32>
    %12 = arith.maximumf %10, %11 : vector<2x2xf32>
    %c0_8 = arith.constant 0 : index
    %c0_9 = arith.constant 0 : index
    %13 = vector.load %arg3[%c0_8, %c0_9] : memref<4x2xf32, #tpu.memory_space<vmem>>, vector<4x2xf32>
    %cst_10 = arith.constant dense<0.000000e+00> : vector<4x2xf32>
    %14 = tpu.matmul %13, %12, %cst_10 {dimension_numbers = #tpu.dot_dimension_numbers<[1], [0], [0], [1], [0, 0, 1, 1], [], []>} : vector<4x2xf32>, vector<2x2xf32>, vector<4x2xf32> -> vector<4x2xf32>
    %15 = vector.extract_strided_slice %14 {offsets = [0, 0], sizes = [4, 1], strides = [1, 1]} : vector<4x2xf32> to vector<4x1xf32>
    %16 = vector.extract_strided_slice %14 {offsets = [0, 1], sizes = [4, 1], strides = [1, 1]} : vector<4x2xf32> to vector<4x1xf32>
    %17 = arith.addf %15, %16 : vector<4x1xf32>
    %cst_11 = arith.constant 0.000000e+00 : f32
    %18 = vector.broadcast %cst_11 : f32 to vector<4x1xf32>
    %19 = arith.subf %18, %17 : vector<4x1xf32>
    %20 = math.exp %19 : vector<4x1xf32>
    %cst_12 = arith.constant 1.000000e+00 : f32
    %21 = vector.broadcast %cst_12 : f32 to vector<4x1xf32>
    %22 = arith.addf %21, %20 : vector<4x1xf32>
    %cst_13 = arith.constant 1.000000e+00 : f32
    %23 = vector.broadcast %cst_13 : f32 to vector<4x1xf32>
    %24 = arith.divf %23, %22 : vector<4x1xf32>
    %cst_14 = arith.constant 1.000000e+00 : f32
    %25 = vector.broadcast %cst_14 : f32 to vector<4x1xf32>
    %26 = arith.addf %24, %25 : vector<4x1xf32>
    %27 = vector.broadcast %26 : vector<4x1xf32> to vector<4x256xf32>
    %28 = arith.mulf %1, %27 : vector<4x256xf32>
    %c0_15 = arith.constant 0 : index
    %c0_16 = arith.constant 0 : index
    %c0_17 = arith.constant 0 : index
    %29 = vector.load %arg4[%c0_15, %c0_16, %c0_17] : memref<1x4x256xf32, #tpu.memory_space<vmem>>, vector<1x4x256xf32>
    %30 = vector.shape_cast %29 : vector<1x4x256xf32> to vector<4x256xf32>
    %31 = vector.shape_cast %28 : vector<4x256xf32> to vector<1x4x256xf32>
    tpu.vector_store %arg4[%c0_15, %c0_16, %c0_17], %31 {strides = array<i32>} : memref<1x4x256xf32, #tpu.memory_space<vmem>>, vector<1x4x256xf32>,
    return
  }
  func.func @transform_0(%arg0: i32) -> (i32, i32, i32) {
    %c0_i32 = arith.constant 0 : i32
    %c0_i32_0 = arith.constant 0 : i32
    %c0_i32_1 = arith.constant 0 : i32
    return %arg0, %c0_i32, %c0_i32_0 : i32, i32, i32
  }
  func.func @transform_1(%arg0: i32) -> (i32, i32) {
    %c0_i32 = arith.constant 0 : i32
    %c0_i32_0 = arith.constant 0 : i32
    %c0_i32_1 = arith.constant 0 : i32
    return %c0_i32, %c0_i32_0 : i32, i32
  }
  func.func @transform_2(%arg0: i32) -> (i32, i32) {
    %c0_i32 = arith.constant 0 : i32
    %c0_i32_0 = arith.constant 0 : i32
    %c0_i32_1 = arith.constant 0 : i32
    return %c0_i32, %c0_i32_0 : i32, i32
  }
  func.func @transform_3(%arg0: i32) -> (i32, i32, i32) {
    %c0_i32 = arith.constant 0 : i32
    %c0_i32_0 = arith.constant 0 : i32
    %c0_i32_1 = arith.constant 0 : i32
    return %arg0, %c0_i32, %c0_i32_0 : i32, i32, i32
  }
}

</mosaic_0001>

<bundles_post_ra>
// kernel: canet_forward.1
= control target key start
LH: loop header
LB: loop body
LE: loop exit
PB: predicated region body
PF: predicated region fallthrough
CT: control target
= control target key end

     0   :  { %s512_s12 = smov 0   ;;  %s547_s0 = inlined_call_operand.vmem [shape: f32[2,4,256], index: 0, kind: input, shape index: {}]   ;;  %s548_s1 = inlined_call_operand.vmem [shape: f32[2,4], index: 1, kind: input, shape index: {}]   ;;  %s549_s2 = inlined_call_operand.vmem [shape: f32[4,2], index: 2, kind: input, shape index: {}]   ;;  %s550_s3 = inlined_call_operand.vmem [shape: f32[2,4,256], index: 3, kind: output, shape index: {}]  }
   0x1 LB: > { %s428_s13 = sadd.s32 4294967295, %s485_s12   ;;  %p432_p0 = scmp.ge.s32.totalorder %s485_s12, 1  ;;  %s485_s12 = sphi %s512_s12, %s13_s12  }
   0x2   : > { %p137_p1 = scmp.lt.s32.totalorder %s485_s12, 3 }
   0x4   : > { %p138_p2 = pnand %p432_p0, %p137_p1 }
   0x5   : > { %p161_p3 = scmp.lt.s32.totalorder (!%p138_p2), %s428_s13, 1  ;;  %s489_s22 = smov (!%p138_p2), 127  }
   0x6   : > { %141 = sbr.rel (%p138_p2) target bundleno = 835 (0x343), region = 32 }
   0xb   : > { %s552_s13 = smov (!%p161_p3, %s428_s13), 1  ;;  %vm175_vm0 = vcmask 1043456   ;;  %v487_v8 = vmov 0.0   ;;  %vm488_vm1 = vmmov 0   ;;  %vm187_vm2 = vcmask 7168  }
   0xc   : > { %s443_s14 = sshll.u32 %s552_s13, 3  ;;  %449 = vmatprep.subr.mxu0 %v487_v8  ;;  %454 = vmatprep.subr.mxu1 %v487_v8  ;;  %v189_v12 = vld [vmem:[%s548_s1] sm:$0x3]  ;;  %vm190_vm3 = vcmask 31744   ;;  %vm273_vm4 = vcmask 1041408   ;;  %vm269_vm5 = vcmask 15360   ;;  %v366_v31 = vlaneseq }
   0xd   : > { %s165_s17 = scalar_lea.vmem %s547_s0, %s443_s14  ;;  %451 = vmatprep.mubr.msk.f32.mxu0 %vm488_vm1, %v487_v8  ;;  %456 = vmatprep.mubr.msk.f32.mxu1 %vm488_vm1, %v487_v8  ;;  %v268_v16 = vld [vmem:[%s549_s2] sm:$0xf]  ;;  %v490_v20 = vmov 0   ;;  %v491_v29 = vmov 839922192   ;;  %s170_s25 = scalar_lea.vmem %s550_s3, %s443_s14 }
   0xe   : > { %v171_v0 = vld [vmem:[%s165_s17] sm:$0xff]  ;;  %472 = vset.pattern.permute.xlu1 %v490_v20  ;;  %473 = vset.pattern.permute.xlu0 %v490_v20  ;;  %v364_v30 = vunpack.c.l.s4 %v491_v29  ;;  %v367_v33 = vshrl.u32 %v366_v31, 7 }
   0xf   : > { %v173_v1 = vcombine.high %v171_v0, %v171_v0  ;;  %v181_v2 = vsel %vm175_vm0, %v171_v0, 0.0  ;;  %v176_v4 = vsel %vm175_vm0, %v171_v0, -inf }
  0x10   : > { %v365_v32 = vunpack.c.0.s8 %v364_v30 }
  0x11   : > { %v182_v3 = vsel %vm175_vm0, %v173_v1, 0.0  ;;  %v177_v5 = vsel %vm175_vm0, %v173_v1, -inf }
  0x12   : > { %v183_v6 = vadd.f32 %v182_v3, %v181_v2  ;;  %v178_v7 = vmax.f32 %v176_v4, %v177_v5  ;;  %v368_v34 = vsub.s32 %v365_v32, %v367_v33 }
  0x14   : > { %184 = vadd.xlane.f32.xlu0 %v183_v6 }
  0x18   : > { %179 = vmax.xlane.f32.xlu0 %v178_v7 }
  0x9d   : > { %v185_v9 = vpop.xlane.xlu0 %184 }
  0x9e   : > { %v186_v10 = vmul.f32 0.00390625, %v185_v9 }
  0xa1   : > { %v180_v11 = vpop.xlane.xlu0 %179 }
  0xa2   : > { %v188_v13 = vsel %vm187_vm2, %v180_v11, %v186_v10 }
  0xa3   : > { %450 = vmatpush3.msk.msra.mxu0 %vm175_vm0, %v188_v13 }
  0xa4   : > { %452 = vmatmul.mubr.msk.f32.vlgmr.msra.gmra.mxu0 %vm190_vm3, %v189_v12 }
 0x164   : > { %v263_v14 = vpop.f32.mrf.mxu0 }
 0x165   : > { %v267_v15 = vmax.f32 %v263_v14, 0.0 }
 0x166   : > { %v453_v17 = vpop.f32.mrf.mxu0 }
 0x167   : > { %455 = vmatpush3.msk.msra.mxu1 %vm273_vm4, %v267_v15 }
 0x168   : > { %457 = vmatmul.mubr.msk.f32.vlgmr.msra.gmra.mxu1 %vm269_vm5, %v268_v16 }
 0x228   : > { %v343_v18 = vpop.f32.mrf.mxu1 }
 0x229   : > { %348 = vrot.lane.b32.xlu1 %v343_v18, %s489_s22 }
 0x22a   : > { %v458_v19 = vpop.f32.mrf.mxu1 }
 0x29b   : > { %v349_v21 = vpop.permute.xlu1 %348 }
 0x29c   : > { %v351_v22 = vadd.f32 %v349_v21, %v343_v18 }
 0x29e   : > { %v352_v23 = vsub.f32 0.0, %v351_v22 }
 0x2a0   : > { %v353_v24 = vmul.f32 1.442695, %v352_v23 }
 0x2a2   : > { %475 = vpow2.f32 %v353_v24 }
 0x2af   : > { %v476_v25 = vpop.eup %475 }
 0x2b0   : > { %v355_v26 = vadd.f32 1.0, %v476_v25 }
 0x2b2   : > { %477 = vrcp.f32 %v355_v26 }
 0x2bf   : > { %v478_v27 = vpop.eup %477 }
 0x2c0   : > { %v358_v28 = vadd.f32 1.0, %v478_v27 }
 0x2c2   : > { %361 = vperm.xlu1 %472, %v358_v28  }
 0x33d   : > { %v362_v35 = vpop.permute.xlu1 %361 }
 0x33e   : > { %v369_v36 = vrot.slane %v362_v35, %v368_v34 }
 0x340   : > { %v371_v37 = vmul.f32 %v369_v36, %v171_v0 }
 0x342   : > { %372 = vst [vmem:[%s170_s25] sm:$0xff] %v371_v37 }
 0x343 PF: > { %s13_s12 = sadd.s32 1, %s485_s12  }
 0x344   : > { %p10_p4 = scmp.ge.s32.totalorder %s13_s12, 4  }
 0x346   :  { %12 = sbr.rel (!%p10_p4) target bundleno = 1 (0x1), region = 62 }

</bundles_post_ra>
